<compile_context>
chip_gen: v5e
topology: v5e:2x2
jax: 0.10.0
libtpu: 0.0.40
codegen_flags: <defaults>
</compile_context>

<pallas_src>
import functools

import jax
import jax.numpy as jnp
from jax import lax
from jax.experimental import pallas as pl
from jax.experimental.pallas import tpu as pltpu


def _attention_kernel(x_ref, phi_ref, wm_ref, wpsi_ref, bpsi_ref,
                      sig_ref, ssum_ref, ssq_ref, *, c_int):
    """Fused theta+W merged matmul / add / relu / psi / sigmoid / BN-stat pass."""
    f32 = jnp.float32
    t = pl.program_id(1)

    # Per-batch stat accumulators live in the resident output block (same block
    # index for every t); zero them at the first pixel tile of each batch.
    @pl.when(t == 0)
    def _():
        ssum_ref[...] = jnp.zeros_like(ssum_ref)
        ssq_ref[...] = jnp.zeros_like(ssq_ref)

    x = x_ref[0]                                               # [C_in, TILE_P]

    # Merged theta + W 1x1 convs: ONE MXU matmul, rows split afterwards.
    m = jnp.dot(wm_ref[...], x, preferred_element_type=f32)   # [C_int+C_in, TILE_P] f32
    theta_x = m[:c_int]                                        # [C_int, TILE_P]
    w_rows = m[c_int:]                                         # [C_in,  TILE_P]

    # f = relu(theta_x + phi_g)
    f = jnp.maximum(theta_x + phi_ref[0].astype(f32), 0.0)     # [C_int, TILE_P] f32

    # psi: full-vreg VPU multiply + sublane reduce (XLU slot), no MXU, no unroll.
    psi = jnp.sum(wpsi_ref[...] * f, axis=0, keepdims=True) + bpsi_ref[0, 0]
    sigm = jax.nn.sigmoid(psi)                                 # [1, TILE_P] f32 (EUP)

    # sigm factors out of the 1x1 W conv:  W @ (sigm * x) == sigm * (W @ x).
    # (W-conv bias omitted: cancelled exactly by BatchNorm mean subtraction.)
    wy = sigm * w_rows                                         # [C_in, TILE_P] f32

    sig_ref[0] = sigm.astype(sig_ref.dtype)

    # Per-batch BatchNorm partial statistics (per-channel sum / sum-of-squares),
    # accumulated in VMEM-resident output blocks; written back once per batch.
    ssum_ref[0] = ssum_ref[0] + jnp.sum(wy, axis=1, keepdims=True)
    ssq_ref[0] = ssq_ref[0] + jnp.sum(wy * wy, axis=1, keepdims=True)


def _bn_apply_kernel(x_ref, sig_ref, ww_ref, scale_ref, shift_ref, o_ref):
    """Recompute wy = sigm * (W @ x) and apply the BatchNorm affine in one pass."""
    f32 = jnp.float32
    wr = jnp.dot(ww_ref[...], x_ref[0], preferred_element_type=f32)   # [C_in, TILE_P]
    wy = sig_ref[0].astype(f32) * wr
    o_ref[0] = (wy * scale_ref[...] + shift_ref[...]).astype(o_ref.dtype)


def _choose_tile_p(P, C_in, C_int, itemsize, *,
                   vmem_budget_bytes=20 << 20, max_tile=4096):
    """Largest multiple-of-128 pixel tile that divides P and fits the VMEM budget."""
    # Per-lane bytes for the fused pass: double-buffered x / phi / sigm streams
    # plus the f32 intermediates (merged matmul rows, f, wy) the compiler keeps live.
    per_lane = ((C_in + C_int + 1) * itemsize * 2        # pipelined input/output tiles
                + (2 * C_int + 2 * C_in) * 4)            # f32 intermediates per lane
    cap = max(128, min(max_tile, vmem_budget_bytes // max(per_lane, 1)))
    if P % 128 != 0 or P <= 128:
        # TODO(synk): for large spatial sizes not divisible by 128, pad P to a
        # 128-multiple instead of taking the full axis as one block.
        return P
    best = 128
    t = 128
    while t <= min(P, cap):
        if P % t == 0:
            best = t
        t += 128
    return best


def grid_attention_forward(x, g, params, *, tile_p=None, vmem_limit_bytes=48 << 20):
    N, C_in, H, W = x.shape
    Ng, C_g, Hg, Wg = g.shape
    assert N == Ng
    C_int = params["w_theta"].shape[0]
    P = H * W
    act_dtype = x.dtype
    itemsize = jnp.dtype(act_dtype).itemsize

    if tile_p is None:
        # Consistent accounting: resident (double-buffered) weights come out of the
        # same budget that limits the pipelined tiles.
        resident = ((C_int + 2 * C_in) * C_in * itemsize * 2
                    + (C_int + 3 * C_in) * 4 * 2)
        budget = max(4 << 20, vmem_limit_bytes // 2 - resident)
        tile_p = _choose_tile_p(P, C_in, C_int, itemsize, vmem_budget_bytes=budget)
    assert P % tile_p == 0, "tile_p must divide H*W"
    T = P // tile_p

    x_f = x.reshape(N, C_in, P)

    # --- phi(g): 1x1 conv + bilinear upsample on the small gating tensor (XLA glue).
    # jax.image.resize 'bilinear' uses half-pixel centers == F.interpolate(align_corners=False).
    # Runs in the activation dtype with f32 MXU accumulation; no Precision.HIGHEST.
    phi_g = jnp.einsum("oc,nchw->nohw",
                       params["w_phi"].astype(act_dtype), g.astype(act_dtype),
                       preferred_element_type=jnp.float32).astype(act_dtype)
    phi_up = jax.image.resize(phi_g, (N, C_int, H, W), method="bilinear")
    phi_up = phi_up.reshape(N, C_int, P).astype(act_dtype)

    # --- merged / pre-cast weights ---
    w_merged = jnp.concatenate([params["w_theta"], params["w_w"]],
                               axis=0).astype(act_dtype)          # [C_int+C_in, C_in]
    w_psi_col = params["w_psi"].reshape(C_int, 1).astype(jnp.float32)
    b_psi = params["b_psi"].reshape(1, 1).astype(jnp.float32)

    fused_cparams = pltpu.CompilerParams(
        dimension_semantics=("parallel", "arbitrary"),
        vmem_limit_bytes=vmem_limit_bytes,
    )

    # --- fused theta / add / relu / psi / sigmoid / gate / BN-stats kernel ---
    # TODO(synk): sweep pipeline_mode=pl.Buffered(3) on the x / phi_up streams for v5e.
    sigm, ssum, ssq = pl.pallas_call(
        functools.partial(_attention_kernel, c_int=C_int),
        grid=(N, T),
        in_specs=[
            pl.BlockSpec((1, C_in, tile_p), lambda b, t: (b, 0, t)),     # x
            pl.BlockSpec((1, C_int, tile_p), lambda b, t: (b, 0, t)),    # phi_up
            pl.BlockSpec((C_int + C_in, C_in), lambda b, t: (0, 0)),     # merged theta|W
            pl.BlockSpec((C_int, 1), lambda b, t: (0, 0)),               # w_psi column
            pl.BlockSpec(memory_space=pltpu.MemorySpace.SMEM),           # b_psi [1,1]
        ],
        out_specs=(
            pl.BlockSpec((1, 1, tile_p), lambda b, t: (b, 0, t)),        # sigm (lane-dense)
            pl.BlockSpec((1, C_in, 1), lambda b, t: (b, 0, 0)),          # per-batch sum
            pl.BlockSpec((1, C_in, 1), lambda b, t: (b, 0, 0)),          # per-batch sum sq
        ),
        out_shape=(
            jax.ShapeDtypeStruct((N, 1, P), act_dtype),
            jax.ShapeDtypeStruct((N, C_in, 1), jnp.float32),
            jax.ShapeDtypeStruct((N, C_in, 1), jnp.float32),
        ),
        compiler_params=fused_cparams,
    )(x_f, phi_up, w_merged, w_psi_col, b_psi)

    # sub_sample_factor == (1, 1): theta_x spatial == x spatial, so
    # F.interpolate(sigm_psi_f, size=input_size[2:], mode='bilinear') is the identity.
    # TODO(synk): a non-unit sub_sample_factor would need a resize of sigm back to x's
    # resolution between the gating computation and the W branch.

    # --- BatchNorm2d (training-mode, biased batch stats): tiny combine over N ---
    cnt = jnp.float32(N * P)
    mean = jnp.sum(ssum[:, :, 0], axis=0) / cnt                       # [C_in]
    var = jnp.maximum(jnp.sum(ssq[:, :, 0], axis=0) / cnt - mean * mean, 0.0)
    # TODO(synk): switch to a shifted-moments / Welford combine if |mean| >> std
    # cancellation matters for training use.
    inv = lax.rsqrt(var + 1e-5)
    gamma = params["bn_gamma"].astype(jnp.float32)
    beta = params["bn_beta"].astype(jnp.float32)
    scale = (gamma * inv).reshape(C_in, 1)
    shift = (beta - mean * gamma * inv).reshape(C_in, 1)

    bn_cparams = pltpu.CompilerParams(
        dimension_semantics=("parallel", "parallel"),
        vmem_limit_bytes=vmem_limit_bytes,
    )

    # --- BN-apply pass: recompute wy = sigm * (W @ x); no wy_pre HBM round trip ---
    w_y = pl.pallas_call(
        _bn_apply_kernel,
        grid=(N, T),
        in_specs=[
            pl.BlockSpec((1, C_in, tile_p), lambda b, t: (b, 0, t)),     # x
            pl.BlockSpec((1, 1, tile_p), lambda b, t: (b, 0, t)),        # sigm
            pl.BlockSpec((C_in, C_in), lambda b, t: (0, 0)),             # w_w (resident)
            pl.BlockSpec((C_in, 1), lambda b, t: (0, 0)),                # BN scale
            pl.BlockSpec((C_in, 1), lambda b, t: (0, 0)),                # BN shift
        ],
        out_specs=pl.BlockSpec((1, C_in, tile_p), lambda b, t: (b, 0, t)),
        out_shape=jax.ShapeDtypeStruct((N, C_in, P), act_dtype),
        compiler_params=bn_cparams,
    )(x_f, sigm, params["w_w"].astype(act_dtype), scale, shift)

    return w_y.reshape(N, C_in, H, W), sigm.reshape(N, 1, H, W)


def make_params(key, in_channels, gating_channels, inter_channels):
    k1, k2, k3, k4 = jax.random.split(key, 4)
    # deterministic "kaiming-like" init: normal * sqrt(2 / fan_in)
    # NOTE: the W-conv bias is intentionally omitted -- a per-channel bias
    # immediately before training-mode BatchNorm is cancelled exactly by the
    # mean subtraction, so the forward output is mathematically identical.
    return dict(
        w_theta=(jax.random.normal(k1, (inter_channels, in_channels))
                 * jnp.sqrt(2.0 / in_channels)).astype(jnp.float32),
        w_phi=(jax.random.normal(k2, (inter_channels, gating_channels))
               * jnp.sqrt(2.0 / gating_channels)).astype(jnp.float32),
        w_psi=(jax.random.normal(k3, (inter_channels,))
               * jnp.sqrt(2.0 / inter_channels)).astype(jnp.float32),
        # psi bias initialized to 3.0 (concatenation_sigmoid mode, per the module)
        b_psi=jnp.full((1, 1), 3.0, dtype=jnp.float32),
        w_w=(jax.random.normal(k4, (in_channels, in_channels))
             * jnp.sqrt(2.0 / in_channels)).astype(jnp.float32),
        bn_gamma=jnp.ones((in_channels,), dtype=jnp.float32),
        bn_beta=jnp.zeros((in_channels,), dtype=jnp.float32),
    )


if __name__ == "__main__":
    N, C_in, C_g = 2, 4, 6
    C_int = max(1, C_in // 2)       # inter_channels default
    H = W = 16                      # x spatial
    Hg = Wg = 8                     # gating signal spatial (upsampled inside forward)

    key = jax.random.PRNGKey(0)
    kx, kg, kp = jax.random.split(key, 3)
    x = jax.random.normal(kx, (N, C_in, H, W), dtype=jnp.float32)
    g = jax.random.normal(kg, (N, C_g, Hg, Wg), dtype=jnp.float32)
    params = make_params(kp, C_in, C_g, C_int)

    # tile_p=128 exercises the multi-tile pixel grid and the cross-tile BN-stat
    # accumulation at this toy size (P = 256 -> T = 2).
    fwd = jax.jit(functools.partial(grid_attention_forward, tile_p=128))
    w_y, sigm_psi_f = fwd(x, g, params)
    jax.block_until_ready((w_y, sigm_psi_f))

    assert w_y.shape == (N, C_in, H, W)
    assert sigm_psi_f.shape == (N, 1, H, W)
    assert bool(jnp.all(jnp.isfinite(w_y))) and bool(jnp.all(jnp.isfinite(sigm_psi_f)))
    print("KERNEL_OK")
</pallas_src>

<mosaic_0001>
module attributes {stable_mosaic.version = 11 : i64} {
  func.func @_attention_kernel(%arg0: i32, %arg1: i32, %arg2: memref<1x4x128xf32, #tpu.memory_space<vmem>>, %arg3: memref<1x2x128xf32, #tpu.memory_space<vmem>>, %arg4: memref<6x4xf32, #tpu.memory_space<vmem>>, %arg5: memref<2x1xf32, #tpu.memory_space<vmem>>, %arg6: memref<1x1xf32, #tpu.memory_space<smem>>, %arg7: memref<1x1x128xf32, #tpu.memory_space<vmem>>, %arg8: memref<1x4x1xf32, #tpu.memory_space<vmem>>, %arg9: memref<1x4x1xf32, #tpu.memory_space<vmem>>) attributes {dimension_semantics = [#tpu.dimension_semantics<parallel>, #tpu.dimension_semantics<arbitrary>], iteration_bounds = array<i64: 2, 2>, scalar_prefetch = 0 : i64, scratch_operands = 0 : i64, tpu.core_type = #tpu.core_type<tc>, window_params = [{transform_indices = @transform_0, window_bounds = array<i64: 1, 4, 128>}, {transform_indices = @transform_1, window_bounds = array<i64: 1, 2, 128>}, {pipeline_mode = #tpu.pipeline_mode<synchronous>, transform_indices = @transform_2, window_bounds = array<i64: 6, 4>}, {pipeline_mode = #tpu.pipeline_mode<synchronous>, transform_indices = @transform_3, window_bounds = array<i64: 2, 1>}, {transform_indices = @transform_4, window_bounds = array<i64: 1, 1>}, {transform_indices = @transform_5, window_bounds = array<i64: 1, 1, 128>}, {transform_indices = @transform_6, window_bounds = array<i64: 1, 4, 1>}, {transform_indices = @transform_7, window_bounds = array<i64: 1, 4, 1>}]} {
    %c0_i32 = arith.constant 0 : i32
    %0 = arith.cmpi eq, %arg1, %c0_i32 : i32
    %1 = arith.extui %0 : i1 to i32
    %c0_i32_0 = arith.constant 0 : i32
    %2 = arith.cmpi ne, %1, %c0_i32_0 : i32
    scf.if %2 {
      %cst_32 = arith.constant 0.000000e+00 : f32
      %49 = vector.broadcast %cst_32 : f32 to vector<1x4x1xf32>
      %c0_33 = arith.constant 0 : index
      %c0_34 = arith.constant 0 : index
      %c0_35 = arith.constant 0 : index
      %50 = vector.load %arg8[%c0_33, %c0_34, %c0_35] : memref<1x4x1xf32, #tpu.memory_space<vmem>>, vector<1x4x1xf32>
      tpu.vector_store %arg8[%c0_33, %c0_34, %c0_35], %49 {strides = array<i32>} : memref<1x4x1xf32, #tpu.memory_space<vmem>>, vector<1x4x1xf32>,
      %cst_36 = arith.constant 0.000000e+00 : f32
      %51 = vector.broadcast %cst_36 : f32 to vector<1x4x1xf32>
      %c0_37 = arith.constant 0 : index
      %c0_38 = arith.constant 0 : index
      %c0_39 = arith.constant 0 : index
      %52 = vector.load %arg9[%c0_37, %c0_38, %c0_39] : memref<1x4x1xf32, #tpu.memory_space<vmem>>, vector<1x4x1xf32>
      tpu.vector_store %arg9[%c0_37, %c0_38, %c0_39], %51 {strides = array<i32>} : memref<1x4x1xf32, #tpu.memory_space<vmem>>, vector<1x4x1xf32>,
    } else {
    }
    %c0 = arith.constant 0 : index
    %c0_1 = arith.constant 0 : index
    %c0_2 = arith.constant 0 : index
    %3 = vector.load %arg2[%c0, %c0_1, %c0_2] : memref<1x4x128xf32, #tpu.memory_space<vmem>>, vector<1x4x128xf32>
    %4 = vector.shape_cast %3 : vector<1x4x128xf32> to vector<4x128xf32>
    %c0_3 = arith.constant 0 : index
    %c0_4 = arith.constant 0 : index
    %5 = vector.load %arg4[%c0_3, %c0_4] : memref<6x4xf32, #tpu.memory_space<vmem>>, vector<6x4xf32>
    %cst = arith.constant dense<0.000000e+00> : vector<6x128xf32>
    %6 = tpu.matmul %5, %4, %cst {dimension_numbers = #tpu.dot_dimension_numbers<[1], [0], [0], [1], [0, 0, 1, 1], [], []>} : vector<6x4xf32>, vector<4x128xf32>, vector<6x128xf32> -> vector<6x128xf32>
    %7 = vector.extract_strided_slice %6 {offsets = [0, 0], sizes = [2, 128], strides = [1, 1]} : vector<6x128xf32> to vector<2x128xf32>
    %8 = vector.extract_strided_slice %6 {offsets = [2, 0], sizes = [4, 128], strides = [1, 1]} : vector<6x128xf32> to vector<4x128xf32>
    %c0_5 = arith.constant 0 : index
    %c0_6 = arith.constant 0 : index
    %c0_7 = arith.constant 0 : index
    %9 = vector.load %arg3[%c0_5, %c0_6, %c0_7] : memref<1x2x128xf32, #tpu.memory_space<vmem>>, vector<1x2x128xf32>
    %10 = vector.shape_cast %9 : vector<1x2x128xf32> to vector<2x128xf32>
    %11 = arith.addf %7, %10 : vector<2x128xf32>
    %cst_8 = arith.constant 0.000000e+00 : f32
    %12 = vector.broadcast %cst_8 : f32 to vector<2x128xf32>
    %13 = arith.maximumf %11, %12 : vector<2x128xf32>
    %c0_9 = arith.constant 0 : index
    %c0_10 = arith.constant 0 : index
    %14 = vector.load %arg5[%c0_9, %c0_10] : memref<2x1xf32, #tpu.memory_space<vmem>>, vector<2x1xf32>
    %15 = vector.broadcast %14 : vector<2x1xf32> to vector<2x128xf32>
    %16 = arith.mulf %15, %13 : vector<2x128xf32>
    %cst_11 = arith.constant dense<0.000000e+00> : vector<128xf32>
    %17 = vector.multi_reduction <add>, %16, %cst_11 [0] : vector<2x128xf32> to vector<128xf32>
    %18 = vector.shape_cast %17 : vector<128xf32> to vector<1x128xf32>
    %c0_12 = arith.constant 0 : index
    %c0_13 = arith.constant 0 : index
    %19 = memref.load %arg6[%c0_12, %c0_13] : memref<1x1xf32, #tpu.memory_space<smem>>
    %20 = vector.broadcast %19 : f32 to vector<1x128xf32>
    %21 = arith.addf %18, %20 : vector<1x128xf32>
    %22 = arith.negf %21 : vector<1x128xf32>
    %23 = math.exp %22 : vector<1x128xf32>
    %cst_14 = arith.constant 1.000000e+00 : f32
    %24 = vector.broadcast %cst_14 : f32 to vector<1x128xf32>
    %25 = arith.addf %24, %23 : vector<1x128xf32>
    %26 = arith.divf %24, %25 : vector<1x128xf32>
    %27 = vector.broadcast %26 : vector<1x128xf32> to vector<4x128xf32>
    %28 = arith.mulf %27, %8 : vector<4x128xf32>
    %c0_15 = arith.constant 0 : index
    %c0_16 = arith.constant 0 : index
    %c0_17 = arith.constant 0 : index
    %29 = vector.load %arg7[%c0_15, %c0_16, %c0_17] : memref<1x1x128xf32, #tpu.memory_space<vmem>>, vector<1x1x128xf32>
    %30 = vector.shape_cast %29 : vector<1x1x128xf32> to vector<1x128xf32>
    %31 = vector.shape_cast %26 : vector<1x128xf32> to vector<1x1x128xf32>
    tpu.vector_store %arg7[%c0_15, %c0_16, %c0_17], %31 {strides = array<i32>} : memref<1x1x128xf32, #tpu.memory_space<vmem>>, vector<1x1x128xf32>,
    %c0_18 = arith.constant 0 : index
    %c0_19 = arith.constant 0 : index
    %c0_20 = arith.constant 0 : index
    %32 = vector.load %arg8[%c0_18, %c0_19, %c0_20] : memref<1x4x1xf32, #tpu.memory_space<vmem>>, vector<1x4x1xf32>
    %33 = vector.shape_cast %32 : vector<1x4x1xf32> to vector<4x1xf32>
    %cst_21 = arith.constant dense<0.000000e+00> : vector<4xf32>
    %34 = vector.multi_reduction <add>, %28, %cst_21 [1] : vector<4x128xf32> to vector<4xf32>
    %35 = vector.shape_cast %34 : vector<4xf32> to vector<4x1xf32>
    %36 = arith.addf %33, %35 : vector<4x1xf32>
    %c0_22 = arith.constant 0 : index
    %c0_23 = arith.constant 0 : index
    %c0_24 = arith.constant 0 : index
    %37 = vector.load %arg8[%c0_22, %c0_23, %c0_24] : memref<1x4x1xf32, #tpu.memory_space<vmem>>, vector<1x4x1xf32>
    %38 = vector.shape_cast %37 : vector<1x4x1xf32> to vector<4x1xf32>
    %39 = vector.shape_cast %36 : vector<4x1xf32> to vector<1x4x1xf32>
    tpu.vector_store %arg8[%c0_22, %c0_23, %c0_24], %39 {strides = array<i32>} : memref<1x4x1xf32, #tpu.memory_space<vmem>>, vector<1x4x1xf32>,
    %c0_25 = arith.constant 0 : index
    %c0_26 = arith.constant 0 : index
    %c0_27 = arith.constant 0 : index
    %40 = vector.load %arg9[%c0_25, %c0_26, %c0_27] : memref<1x4x1xf32, #tpu.memory_space<vmem>>, vector<1x4x1xf32>
    %41 = vector.shape_cast %40 : vector<1x4x1xf32> to vector<4x1xf32>
    %42 = arith.mulf %28, %28 : vector<4x128xf32>
    %cst_28 = arith.constant dense<0.000000e+00> : vector<4xf32>
    %43 = vector.multi_reduction <add>, %42, %cst_28 [1] : vector<4x128xf32> to vector<4xf32>
    %44 = vector.shape_cast %43 : vector<4xf32> to vector<4x1xf32>
    %45 = arith.addf %41, %44 : vector<4x1xf32>
    %c0_29 = arith.constant 0 : index
    %c0_30 = arith.constant 0 : index
    %c0_31 = arith.constant 0 : index
    %46 = vector.load %arg9[%c0_29, %c0_30, %c0_31] : memref<1x4x1xf32, #tpu.memory_space<vmem>>, vector<1x4x1xf32>
    %47 = vector.shape_cast %46 : vector<1x4x1xf32> to vector<4x1xf32>
    %48 = vector.shape_cast %45 : vector<4x1xf32> to vector<1x4x1xf32>
    tpu.vector_store %arg9[%c0_29, %c0_30, %c0_31], %48 {strides = array<i32>} : memref<1x4x1xf32, #tpu.memory_space<vmem>>, vector<1x4x1xf32>,
    return
  }
  func.func @transform_0(%arg0: i32, %arg1: i32) -> (i32, i32, i32) {
    %c0_i32 = arith.constant 0 : i32
    %c0_i32_0 = arith.constant 0 : i32
    return %arg0, %c0_i32, %arg1 : i32, i32, i32
  }
  func.func @transform_1(%arg0: i32, %arg1: i32) -> (i32, i32, i32) {
    %c0_i32 = arith.constant 0 : i32
    %c0_i32_0 = arith.constant 0 : i32
    return %arg0, %c0_i32, %arg1 : i32, i32, i32
  }
  func.func @transform_2(%arg0: i32, %arg1: i32) -> (i32, i32) {
    %c0_i32 = arith.constant 0 : i32
    %c0_i32_0 = arith.constant 0 : i32
    %c0_i32_1 = arith.constant 0 : i32
    return %c0_i32, %c0_i32_0 : i32, i32
  }
  func.func @transform_3(%arg0: i32, %arg1: i32) -> (i32, i32) {
    %c0_i32 = arith.constant 0 : i32
    %c0_i32_0 = arith.constant 0 : i32
    %c0_i32_1 = arith.constant 0 : i32
    return %c0_i32, %c0_i32_0 : i32, i32
  }
  func.func @transform_4(%arg0: i32, %arg1: i32) -> (i32, i32) {
    %c0_i32 = arith.constant 0 : i32
    %c0_i32_0 = arith.constant 0 : i32
    %c0_i32_1 = arith.constant 0 : i32
    return %c0_i32, %c0_i32_0 : i32, i32
  }
  func.func @transform_5(%arg0: i32, %arg1: i32) -> (i32, i32, i32) {
    %c0_i32 = arith.constant 0 : i32
    %c0_i32_0 = arith.constant 0 : i32
    return %arg0, %c0_i32, %arg1 : i32, i32, i32
  }
  func.func @transform_6(%arg0: i32, %arg1: i32) -> (i32, i32, i32) {
    %c0_i32 = arith.constant 0 : i32
    %c0_i32_0 = arith.constant 0 : i32
    %c0_i32_1 = arith.constant 0 : i32
    return %arg0, %c0_i32, %c0_i32_0 : i32, i32, i32
  }
  func.func @transform_7(%arg0: i32, %arg1: i32) -> (i32, i32, i32) {
    %c0_i32 = arith.constant 0 : i32
    %c0_i32_0 = arith.constant 0 : i32
    %c0_i32_1 = arith.constant 0 : i32
    return %arg0, %c0_i32, %c0_i32_0 : i32, i32, i32
  }
}

module attributes {stable_mosaic.version = 11 : i64} {
  func.func @_bn_apply_kernel(%arg0: i32, %arg1: i32, %arg2: memref<1x4x128xf32, #tpu.memory_space<vmem>>, %arg3: memref<1x1x128xf32, #tpu.memory_space<vmem>>, %arg4: memref<4x4xf32, #tpu.memory_space<vmem>>, %arg5: memref<4x1xf32, #tpu.memory_space<vmem>>, %arg6: memref<4x1xf32, #tpu.memory_space<vmem>>, %arg7: memref<1x4x128xf32, #tpu.memory_space<vmem>>) attributes {dimension_semantics = [#tpu.dimension_semantics<parallel>, #tpu.dimension_semantics<parallel>], iteration_bounds = array<i64: 2, 2>, scalar_prefetch = 0 : i64, scratch_operands = 0 : i64, tpu.core_type = #tpu.core_type<tc>, window_params = [{transform_indices = @transform_0, window_bounds = array<i64: 1, 4, 128>}, {transform_indices = @transform_1, window_bounds = array<i64: 1, 1, 128>}, {pipeline_mode = #tpu.pipeline_mode<synchronous>, transform_indices = @transform_2, window_bounds = array<i64: 4, 4>}, {pipeline_mode = #tpu.pipeline_mode<synchronous>, transform_indices = @transform_3, window_bounds = array<i64: 4, 1>}, {pipeline_mode = #tpu.pipeline_mode<synchronous>, transform_indices = @transform_4, window_bounds = array<i64: 4, 1>}, {transform_indices = @transform_5, window_bounds = array<i64: 1, 4, 128>}]} {
    %c0 = arith.constant 0 : index
    %c0_0 = arith.constant 0 : index
    %0 = vector.load %arg4[%c0, %c0_0] : memref<4x4xf32, #tpu.memory_space<vmem>>, vector<4x4xf32>
    %c0_1 = arith.constant 0 : index
    %c0_2 = arith.constant 0 : index
    %c0_3 = arith.constant 0 : index
    %1 = vector.load %arg2[%c0_1, %c0_2, %c0_3] : memref<1x4x128xf32, #tpu.memory_space<vmem>>, vector<1x4x128xf32>
    %2 = vector.shape_cast %1 : vector<1x4x128xf32> to vector<4x128xf32>
    %cst = arith.constant dense<0.000000e+00> : vector<4x128xf32>
    %3 = tpu.matmul %0, %2, %cst {dimension_numbers = #tpu.dot_dimension_numbers<[1], [0], [0], [1], [0, 0, 1, 1], [], []>} : vector<4x4xf32>, vector<4x128xf32>, vector<4x128xf32> -> vector<4x128xf32>
    %c0_4 = arith.constant 0 : index
    %c0_5 = arith.constant 0 : index
    %c0_6 = arith.constant 0 : index
    %4 = vector.load %arg3[%c0_4, %c0_5, %c0_6] : memref<1x1x128xf32, #tpu.memory_space<vmem>>, vector<1x1x128xf32>
    %5 = vector.shape_cast %4 : vector<1x1x128xf32> to vector<1x128xf32>
    %6 = vector.broadcast %5 : vector<1x128xf32> to vector<4x128xf32>
    %7 = arith.mulf %6, %3 : vector<4x128xf32>
    %c0_7 = arith.constant 0 : index
    %c0_8 = arith.constant 0 : index
    %8 = vector.load %arg5[%c0_7, %c0_8] : memref<4x1xf32, #tpu.memory_space<vmem>>, vector<4x1xf32>
    %9 = vector.broadcast %8 : vector<4x1xf32> to vector<4x128xf32>
    %10 = arith.mulf %7, %9 : vector<4x128xf32>
    %c0_9 = arith.constant 0 : index
    %c0_10 = arith.constant 0 : index
    %11 = vector.load %arg6[%c0_9, %c0_10] : memref<4x1xf32, #tpu.memory_space<vmem>>, vector<4x1xf32>
    %12 = vector.broadcast %11 : vector<4x1xf32> to vector<4x128xf32>
    %13 = arith.addf %10, %12 : vector<4x128xf32>
    %c0_11 = arith.constant 0 : index
    %c0_12 = arith.constant 0 : index
    %c0_13 = arith.constant 0 : index
    %14 = vector.load %arg7[%c0_11, %c0_12, %c0_13] : memref<1x4x128xf32, #tpu.memory_space<vmem>>, vector<1x4x128xf32>
    %15 = vector.shape_cast %14 : vector<1x4x128xf32> to vector<4x128xf32>
    %16 = vector.shape_cast %13 : vector<4x128xf32> to vector<1x4x128xf32>
    tpu.vector_store %arg7[%c0_11, %c0_12, %c0_13], %16 {strides = array<i32>} : memref<1x4x128xf32, #tpu.memory_space<vmem>>, vector<1x4x128xf32>,
    return
  }
  func.func @transform_0(%arg0: i32, %arg1: i32) -> (i32, i32, i32) {
    %c0_i32 = arith.constant 0 : i32
    %c0_i32_0 = arith.constant 0 : i32
    return %arg0, %c0_i32, %arg1 : i32, i32, i32
  }
  func.func @transform_1(%arg0: i32, %arg1: i32) -> (i32, i32, i32) {
    %c0_i32 = arith.constant 0 : i32
    %c0_i32_0 = arith.constant 0 : i32
    return %arg0, %c0_i32, %arg1 : i32, i32, i32
  }
  func.func @transform_2(%arg0: i32, %arg1: i32) -> (i32, i32) {
    %c0_i32 = arith.constant 0 : i32
    %c0_i32_0 = arith.constant 0 : i32
    %c0_i32_1 = arith.constant 0 : i32
    return %c0_i32, %c0_i32_0 : i32, i32
  }
  func.func @transform_3(%arg0: i32, %arg1: i32) -> (i32, i32) {
    %c0_i32 = arith.constant 0 : i32
    %c0_i32_0 = arith.constant 0 : i32
    %c0_i32_1 = arith.constant 0 : i32
    return %c0_i32, %c0_i32_0 : i32, i32
  }
  func.func @transform_4(%arg0: i32, %arg1: i32) -> (i32, i32) {
    %c0_i32 = arith.constant 0 : i32
    %c0_i32_0 = arith.constant 0 : i32
    %c0_i32_1 = arith.constant 0 : i32
    return %c0_i32, %c0_i32_0 : i32, i32
  }
  func.func @transform_5(%arg0: i32, %arg1: i32) -> (i32, i32, i32) {
    %c0_i32 = arith.constant 0 : i32
    %c0_i32_0 = arith.constant 0 : i32
    return %arg0, %c0_i32, %arg1 : i32, i32, i32
  }
}

</mosaic_0001>

<bundles_post_ra>
// kernel: grid_attention_forward.3
= control target key start
LH: loop header
LB: loop body
LE: loop exit
PB: predicated region body
PF: predicated region fallthrough
CT: control target
= control target key end

     0   :  { %s563_s18 = smov 0   ;;  %s565_s19 = smov 0   ;;  %s626_s0 = inlined_call_operand.vmem [shape: f32[2,4,256], index: 0, kind: input, shape index: {}]   ;;  %s627_s1 = inlined_call_operand.vmem [shape: f32[2,1,256], index: 1, kind: input, shape index: {}]   ;;  %s628_s2 = inlined_call_operand.vmem [shape: f32[4,4], index: 2, kind: input, shape index: {}]   ;;  %s629_s3 = inlined_call_operand.vmem [shape: f32[4,1], index: 3, kind: input, shape index: {}]   ;;  %s630_s4 = inlined_call_operand.vmem [shape: f32[4,1], index: 4, kind: input, shape index: {}]   ;;  %s631_s5 = inlined_call_operand.vmem [shape: f32[2,4,256], index: 5, kind: output, shape index: {}]  }
   0x1   :  { %s567_s20 = smov 0   ;;  %s569_s21 = smov 0  }
   0x2   :  { %s571_s22 = smov 0  }
   0x3 LB: > { %s24_s23 = sadd.s32 1, %s522_s20  ;;  %s27_s24 = sadd.s32 1, %s526_s21  ;;  %s530_s22 = sphi %s571_s22, %s15_s22   ;;  %s526_s21 = sphi %s569_s21, %s635_s21   ;;  %s522_s20 = sphi %s567_s20, %s634_s20   ;;  %s518_s19 = sphi %s565_s19, %s633_s19   ;;  %s514_s18 = sphi %s563_s18, %s632_s18  }
   0x4   : > { %p25_p0 = scmp.ge.s32.totalorder %s24_s23, 2  ;;  %p439_p1 = scmp.ge.s32.totalorder %s530_s22, 1 }
   0x5   : > { %p220_p2 = scmp.lt.s32.totalorder %s530_s22, 5 }
   0x6   : > { %s637_s23 = smov (%p25_p0, %s24_s23), 0  ;;  %s639_s24 = smov (!%p25_p0, %s27_s24), %s526_s21 }
   0x7   : > { %p221_p3 = pnand %p439_p1, %p220_p2  ;;  %p29_p4 = scmp.ge.s32.totalorder %s639_s24, 2 }
   0x8   : > { %p261_p5 = scmp.lt.s32.totalorder (!%p221_p3), %s518_s19, 1  ;;  %p263_p6 = scmp.lt.s32.totalorder (!%p221_p3), %s514_s18, 1 }
   0x9   : > { %s641_s24 = smov (%p29_p4, %s639_s24), 0  ;;  %224 = sbr.rel (%p221_p3) target bundleno = 154 (0x9a), region = 40 }
   0xe   : > { %v319_v0 = vld [vmem:[%s629_s3] sm:$0xf]  ;;  %v532_v1 = vmov 0   ;;  %s643_s19 = smov (!%p261_p5, %s518_s19), 1  ;;  %s645_s18 = smov (!%p263_p6, %s514_s18), 1  ;;  %vm290_vm0 = vcmask 1043456  }
   0xf   : > { %490 = vset.pattern.permute.xlu0 %v532_v1  ;;  %s440_s27 = sshll.u32 %s643_s19, 1  ;;  %v284_v2 = vld [vmem:[%s628_s2] sm:$0xf]  ;;  %vm286_vm1 = vcmask 31744  }
  0x10   : > { %322 = vperm.xlu0 %490, %v319_v0   ;;  %s266_s28 = sadd.s32 %s440_s27, %s645_s18  ;;  %v326_v3 = vld [vmem:[%s630_s4] sm:$0xf] }
  0x11   : > { %s441_s29 = sshll.u32 %s266_s28, 2  ;;  %s275_s9 = scalar_lea.vmem %s627_s1, %s266_s28 }
  0x12   : > { %s268_s12 = scalar_lea.vmem %s626_s0, %s441_s29  ;;  %v491_v6 = vld [vmem:[%s275_s9] ss:$0 sm:$0xff]  ;;  %s283_s17 = scalar_lea.vmem %s631_s5, %s441_s29 }
  0x13   : > { %v285_v4 = vld [vmem:[%s268_s12] sm:$0xf] }
  0x14   : > { %445 = vmatpush.msk.msra.mxu0 %vm290_vm0, %v285_v4 }
  0x15   : > { %446 = vmatmul.msk.f32.vlgmr.msra.gmra.mxu0 %vm286_vm1, %v284_v2 }
  0x18   : > { %329 = vperm.xlu0 %490, %v326_v3  }
  0x82   : > { %v323_v5 = vpop.permute.xlu0 %322 }
  0x8a   : > { %v330_v10 = vpop.permute.xlu0 %329 }
  0x92   : > { %v311_v7 = vpop.f32.mrf.mxu0 }
  0x93   : > { %v318_v8 = vmul.f32 %v491_v6, %v311_v7 }
  0x95   : > { %v325_v9 = vmul.f32 %v323_v5, %v318_v8 }
  0x97   : > { %v332_v11 = vadd.f32 %v330_v10, %v325_v9 }
  0x99   : > { %333 = vst [vmem:[%s283_s17] sm:$0xf] %v332_v11 }
  0x9a PF: > { %s15_s22 = sadd.s32 1, %s530_s22   ;;  %s632_s18 = smov %s522_s20 }
  0x9b   : > { %p12_p7 = scmp.ge.s32.totalorder %s15_s22, 6   ;;  %s633_s19 = smov %s526_s21 }
  0x9c   : > { %s634_s20 = smov %s637_s23  ;;  %s635_s21 = smov %s641_s24 }
  0x9d   :  { %14 = sbr.rel (!%p12_p7) target bundleno = 3 (0x3), region = 73 }

// kernel: grid_attention_forward.2
= control target key start
LH: loop header
LB: loop body
LE: loop exit
PB: predicated region body
PF: predicated region fallthrough
CT: control target
= control target key end

     0   :  { %s771_s26 = smov 0   ;;  %s773_s27 = smov 0   ;;  %s862_s0 = inlined_call_operand.vmem [shape: f32[2,4,256], index: 0, kind: input, shape index: {}]   ;;  %s863_s1 = inlined_call_operand.vmem [shape: f32[2,2,256], index: 1, kind: input, shape index: {}]   ;;  %s864_s2 = inlined_call_operand.vmem [shape: f32[6,4], index: 2, kind: input, shape index: {}]   ;;  %s865_s3 = inlined_call_operand.vmem [shape: f32[2,1], index: 3, kind: input, shape index: {}]   ;;  %s866_s4 = inlined_call_operand.<no memory space> [shape: f32[1,1], index: 4, kind: input, shape index: {}]   ;;  %s867_s5 = inlined_call_operand.vmem [shape: f32[2,1,256], index: 5, kind: output, shape index: {0}]   ;;  %s868_s6 = inlined_call_operand.vmem [shape: f32[2,4,1], index: 6, kind: output, shape index: {1}]   ;;  %s869_s7 = inlined_call_operand.vmem [shape: f32[2,4,1], index: 7, kind: output, shape index: {2}]  }
   0x1   :  { %13 = sst [smem:[#allocation2]] %s866_s4  ;;  %s775_s28 = smov 0  }
   0x2   :  { %s777_s29 = smov 0   ;;  %s779_s30 = smov 0  }
   0x3 LB: > { %s28_s4 = sadd.s32 1, %s716_s28  ;;  %s31_s8 = sadd.s32 1, %s720_s29  ;;  %s724_s30 = sphi %s779_s30, %s19_s30   ;;  %s720_s29 = sphi %s777_s29, %s873_s29   ;;  %s716_s28 = sphi %s775_s28, %s872_s28   ;;  %s712_s27 = sphi %s773_s27, %s871_s27   ;;  %s708_s26 = sphi %s771_s26, %s870_s26  }
   0x4   : > { %p29_p0 = scmp.ge.s32.totalorder %s28_s4, 2  ;;  %p625_p1 = scmp.ge.s32.totalorder %s724_s30, 1 }
   0x5   : > { %p277_p2 = scmp.lt.s32.totalorder %s724_s30, 5 }
   0x6   : > { %s875_s4 = smov (%p29_p0, %s28_s4), 0  ;;  %s877_s8 = smov (!%p29_p0, %s31_s8), %s720_s29 }
   0x7   : > { %p278_p3 = pnand %p625_p1, %p277_p2  ;;  %p33_p4 = scmp.ge.s32.totalorder %s877_s8, 2 }
   0x8   : > { %p330_p5 = scmp.lt.s32.totalorder (!%p278_p3), %s712_s27, 1  ;;  %p332_p6 = scmp.lt.s32.totalorder (!%p278_p3), %s708_s26, 1 }
   0x9   : > { %s879_s8 = smov (%p33_p4, %s877_s8), 0  ;;  %281 = sbr.rel (%p278_p3) target bundleno = 332 (0x14c), region = 40 }
   0xa   : > { %p633_p7 = scmp.ne.s32.totalorder (!%p278_p3), %s708_s26, 0 }
   0xe   : > { %s881_s27 = smov (!%p330_p5, %s712_s27), 1 }
   0xf   : > { %s333_s9 = scalar_select %p332_p6, %s708_s26, 1 }
  0x10   : > { %s626_s10 = sshll.u32 %s881_s27, 1  ;;  %s631_s11 = sshll.u32 %s881_s27, 2 }
  0x11   : > { %s805_s12 = sadd.s32 %s626_s10, %s333_s9  ;;  %s810_s15 = scalar_lea.vmem %s868_s6, %s631_s11 }
  0x12   : > { %s627_s16 = sshll.u32 %s805_s12, 2  ;;  %s629_s17 = sshll.u32 %s805_s12, 1 }
  0x13   : > { %s337_s20 = scalar_lea.vmem %s862_s0, %s627_s16  ;;  %s345_s23 = scalar_lea.vmem %s863_s1, %s629_s17 }
  0x14   : > { %s352_s27 = scalar_lea.vmem %s867_s5, %s805_s12  ;;  %s827_s13 = scalar_lea.vmem %s869_s7, %s631_s11 }
  0x15   : > { %364 = sbr.rel (%p633_p7) target bundleno = 29 (0x1d), region = 44 }
  0x1a   : > { %vm365_vm0 = vcmask 3072   ;;  %v726_v0 = vmov 0.0  }
  0x1b   : > { %366 = vst.msk [vmem:[%s810_s15] sm:$0xf] %vm365_vm0, %v726_v0 }
  0x1c   : > { %367 = vst.msk [vmem:[%s827_s13] sm:$0xf] %vm365_vm0, %v726_v0 }
  0x1d PF: > { %v368_v1 = vld [vmem:[%s337_s20] sm:$0xf]  ;;  %vm374_vm1 = vcmask 1043456   ;;  %vm370_vm2 = vcmask 31744   ;;  %v727_v4 = vmov 0   ;;  %vm408_vm3 = vcmask 1041408  }
  0x1e   : > { %v369_v2 = vld [vmem:[%s864_s2] sm:$0x3f]  ;;  %634 = vmatpush.msk.msra.mxu0 %vm374_vm1, %v368_v1  ;;  %681 = vset.pattern.permute.xlu0 %v727_v4  ;;  %s416_s26 = sld [smem:[#allocation2]]  ;;  %vm441_vm8 = vcmask 1045506   ;;  %vm449_vm9 = vcmask 3072  }
  0x1f   : > { %v401_v3 = vld [vmem:[%s865_s3] sm:$0x3]  ;;  %635 = vmatmul.msk.f32.vlgmr.msra.gmra.mxu0 %vm370_vm2, %v369_v2 }
  0x20   : > { %404 = vperm.xlu0 %681, %v401_v3   ;;  %v398_v5 = vld [vmem:[%s345_s23] sm:$0x3] }
  0x22   : > { %v440_v37 = vld [vmem:[%s810_s15] sm:$0xf] }
  0x23   : > { %v451_v40 = vld [vmem:[%s827_s13] sm:$0xf] }
  0x24   : > { %v417_v17 = vstv %s416_s26 }
  0x92   : > { %v405_v8 = vpop.permute.xlu0 %404 }
  0x9c   : > { %v395_v6 = vpop.f32.mrf.mxu0 }
  0x9d   : > { %v399_v7 = vadd.f32 %v398_v5, %v395_v6 }
  0x9f   : > { %v400_v9 = vmax.f32 %v399_v7, 0.0 }
  0xa1   : > { %v407_v10 = vmul.f32 %v405_v8, %v400_v9 }
  0xa3   : > { %v409_v11 = vsel %vm408_vm3, %v407_v10, 0.0 }
  0xa4   : > { %v410_v12 = vrot.slane %v409_v11, 4 }
  0xa6   : > { %v411_v13 = vadd.f32 %v410_v12, %v409_v11 }
  0xa8   : > { %v412_v14 = vrot.slane %v411_v13, 2 }
  0xaa   : > { %v413_v15 = vadd.f32 %v412_v14, %v411_v13 }
  0xac   : > { %v414_v16 = vrot.slane %v413_v15, 1 }
  0xae   : > { %v415_v18 = vadd.f32 %v414_v16, %v413_v15 }
  0xb0   : > { %v418_v19 = vadd.f32 %v417_v17, %v415_v18 }
  0xb2   : > { %v636_v20 = vmul.f32 -1.442695, %v418_v19 }
  0xb4   : > { %682 = vpow2.f32 %v636_v20 }
  0xba   : > { %v683_v21 = vpop.eup %682 }
  0xbb   : > { %v422_v22 = vadd.f32 1.0, %v683_v21 }
  0xbd   : > { %684 = vrcp.f32 %v422_v22  ;;  %v434_v26 = vand.u32 2147483648, %v422_v22  ;;  %v432_v28 = vand.u32 2147483647, %v422_v22  ;;  %vm428_vm5 = vweird.f32 %v422_v22 }
  0xbf   : > { %v435_v30 = vor.u32 1.1754944e-38, %v434_v26  ;;  %vm433_vm7 = vcmp.eq.f32.partialorder %v432_v28, 8.507059e+37 }
  0xc3   : > { %v685_v23 = vpop.eup %684 }
  0xc4   : > { %v424_v24 = vmul.f32 %v685_v23, %v422_v22  ;;  %vm429_vm4 = vweird.f32 %v685_v23 }
  0xc5   : > { %vm430_vm6 = vmor %vm428_vm5, %vm429_vm4 }
  0xc6   : > { %v425_v25 = vsub.f32 1.0, %v424_v24 }
  0xc8   : > { %v426_v27 = vmul.f32 %v685_v23, %v425_v25 }
  0xca   : > { %v427_v29 = vadd.f32 %v685_v23, %v426_v27 }
  0xcc   : > { %v431_v31 = vsel %vm430_vm6, %v685_v23, %v427_v29 }
  0xcd   : > { %v436_v32 = vsel %vm433_vm7, %v435_v30, %v431_v31 }
  0xce   : > { %v438_v33 = vmul.f32 %v436_v32, %v395_v6  ;;  %439 = vst [vmem:[%s352_s27] sm:$0x1] %v436_v32 }
  0xd0   : > { %v442_v34 = vsel %vm441_vm8, %v438_v33, 0.0  ;;  %v452_v35 = vmul.f32 %v438_v33, %v438_v33 }
  0xd1   : > { %443 = vadd.xlane.f32.xlu0 %v442_v34 }
  0xd2   : > { %v453_v36 = vsel %vm441_vm8, %v452_v35, 0.0 }
  0xd3   : > { %454 = vadd.xlane.f32.xlu1 %v453_v36 }
 0x144   : > { %v444_v38 = vpop.xlane.xlu0 %443 }
 0x145   : > { %v446_v39 = vrot.slane %v444_v38, 2 }
 0x146   : > { %v455_v41 = vpop.xlane.xlu1 %454 }
 0x147   : > { %v448_v42 = vadd.f32 %v446_v39, %v440_v37  ;;  %v457_v43 = vrot.slane %v455_v41, 2 }
 0x149   : > { %450 = vst.msk [vmem:[%s810_s15] sm:$0xf] %vm449_vm9, %v448_v42  ;;  %v459_v44 = vadd.f32 %v457_v43, %v451_v40 }
 0x14b   : > { %460 = vst.msk [vmem:[%s827_s13] sm:$0xf] %vm449_vm9, %v459_v44 }
 0x14c PF: > { %s19_s30 = sadd.s32 1, %s724_s30   ;;  %s870_s26 = smov %s716_s28 }
 0x14d   : > { %p16_p8 = scmp.ge.s32.totalorder %s19_s30, 6   ;;  %s871_s27 = smov %s720_s29 }
 0x14e   : > { %s872_s28 = smov %s875_s4  ;;  %s873_s29 = smov %s879_s8 }
 0x14f   :  { %18 = sbr.rel (!%p16_p8) target bundleno = 3 (0x3), region = 101 }

</bundles_post_ra>
